<compile_context>
chip_gen: v6e
topology: v6e:2x2x1
jax: 0.10.0
libtpu: 0.0.40
codegen_flags: <defaults>
</compile_context>

<pallas_src>
import functools

import jax
import jax.numpy as jnp
from jax.experimental import pallas as pl
from jax.experimental.pallas import tpu as pltpu


def _round_up(x, m):
    return ((x + m - 1) // m) * m


_ROW_ALIGN = 256                     # multiple of f32 (8) and bf16 (16) sublane tiles
_VMEM_BUDGET = 24 * 1024 * 1024      # target for double-buffered blocks
_VMEM_LIMIT = 32 * 1024 * 1024       # explicit scoped-VMEM limit (safe on v5e/v6e/v7x)


def _select_row_tile(n_rows, row_tile, in_bytes):
    """Pick the row tile: as big as the VMEM budget allows, enough grid steps."""
    # Double-buffered VMEM per row: 3 lane-padded (128-wide) input blocks + f32 out.
    per_row = 2 * 128 * (3 * in_bytes + 4)
    vmem_cap = max(_ROW_ALIGN, (_VMEM_BUDGET // per_row) // _ROW_ALIGN * _ROW_ALIGN)
    tm = min(row_tile, vmem_cap, _round_up(n_rows, _ROW_ALIGN))
    tm = max(_ROW_ALIGN, (tm // _ROW_ALIGN) * _ROW_ALIGN)
    # v7x megacore: prefer >= 8 grid steps (>= 4 per TensorCore) once N is large
    # enough so BlockSpec double-buffering has something to overlap per core.
    if pl.cdiv(n_rows, tm) < 8 and n_rows > 8 * 2048:
        tm = max(2048, _round_up(pl.cdiv(n_rows, 8), _ROW_ALIGN))
        tm = min(tm, vmem_cap)
    return tm


def _reward_mlp_kernel(s_ref, a_ref, ns_ref,
                       w1sd_ref, w1a_ref, w1nd_ref, b1_ref,
                       w2_ref, b2_ref, w3_ref, b3_ref, out_ref):
    """Fused reward MLP for one tile of rows.

    s_ref:   (tm, obs_dim)   streamed states rows      (compute_dtype)
    a_ref:   (tm, act_dim)   streamed actions rows     (compute_dtype)
    ns_ref:  (tm, obs_dim)   streamed next_states rows (compute_dtype)
    w1sd:    (obs_dim, H)    W1_s + W1_d  (folded concat weights)
    w1a:     (act_dim, H)    W1_a
    w1nd:    (obs_dim, H)    -W1_d
    b1, b2:  (1, H)          f32 biases
    w2:      (H, H)
    w3:      (1, H)          scalar-head weights as a row (VPU mul + XLU reduce)
    b3:      (1, 1)
    out:     (tm, 1)         f32 rewards
    """
    f32 = jnp.float32
    # Layer 1: three MXU matmuls accumulated in f32 == concat([s, a, s-ns]) @ W1.
    h = (jnp.dot(s_ref[...], w1sd_ref[...], preferred_element_type=f32)
         + jnp.dot(a_ref[...], w1a_ref[...], preferred_element_type=f32)
         + jnp.dot(ns_ref[...], w1nd_ref[...], preferred_element_type=f32))
    h = jnp.maximum(h + b1_ref[...], 0.0)                           # (tm, H) f32
    # Layer 2.
    h2 = jnp.dot(h.astype(w2_ref.dtype), w2_ref[...], preferred_element_type=f32)
    h2 = jnp.maximum(h2 + b2_ref[...], 0.0)                         # (tm, H) f32
    # Scalar head: VPU multiply + cross-lane (XLU) reduce; MXU has no work here.
    r = jnp.sum(h2 * w3_ref[...], axis=-1, keepdims=True) + b3_ref[...]   # (tm, 1)
    out_ref[...] = r.astype(out_ref.dtype)


def rd_reward_decomposer_forward(states, actions, next_states, params, *,
                                 row_tile=16384, compute_dtype=jnp.bfloat16):
    """Pallas implementation of RDRewardDecomposer.forward.

    states, next_states: (B, T, obs_dim) float32
    actions:             (B, T, act_dim) float32
    returns rewards:     (B, T, 1) float32
    """
    B, T, obs_dim = states.shape
    act_dim = actions.shape[-1]
    w1, b1, w2, b2, w3, b3 = params
    d_in = obs_dim * 2 + act_dim
    assert w1.shape[0] == d_in, (w1.shape, d_in)
    H = w1.shape[1]

    # ---- weight prep (tiny, resident in VMEM) ------------------------------
    # Fold concat([s, a, s - ns]) @ W1 into per-input blocks:
    #   s @ (W1_s + W1_d) + a @ W1_a + ns @ (-W1_d)
    w1_s = w1[:obs_dim]
    w1_a = w1[obs_dim:obs_dim + act_dim]
    w1_d = w1[obs_dim + act_dim:]
    w1sd = (w1_s + w1_d).astype(compute_dtype)     # (obs_dim, H)
    w1a = w1_a.astype(compute_dtype)               # (act_dim, H)
    w1nd = (-w1_d).astype(compute_dtype)           # (obs_dim, H)
    w2c = w2.astype(compute_dtype)                 # (H, H)
    b1r = b1.reshape(1, H).astype(jnp.float32)
    b2r = b2.reshape(1, H).astype(jnp.float32)
    w3r = w3.reshape(1, H).astype(jnp.float32)
    b3r = b3.reshape(1, 1).astype(jnp.float32)

    # ---- streamed inputs: free row-major views, no concat / transpose / pad.
    # (The bf16 cast is the only extra op; in a larger program it fuses into
    #  the producer of states/actions/next_states.)
    N = B * T
    s2 = states.reshape(N, obs_dim).astype(compute_dtype)
    a2 = actions.reshape(N, act_dim).astype(compute_dtype)
    ns2 = next_states.reshape(N, obs_dim).astype(compute_dtype)

    in_bytes = jnp.dtype(compute_dtype).itemsize
    tm = _select_row_tile(N, row_tile, in_bytes)
    grid = (pl.cdiv(N, tm),)      # ragged last block: OOB reads unused, writes dropped

    def _wspec(arr):
        return pl.BlockSpec(arr.shape, lambda i: (0,) * arr.ndim)

    out = pl.pallas_call(
        _reward_mlp_kernel,
        out_shape=jax.ShapeDtypeStruct((N, 1), jnp.float32),
        grid_spec=pltpu.PrefetchScalarGridSpec(
            num_scalar_prefetch=0,
            grid=grid,
            in_specs=[
                pl.BlockSpec((tm, obs_dim), lambda i: (i, 0)),   # states rows
                pl.BlockSpec((tm, act_dim), lambda i: (i, 0)),   # actions rows
                pl.BlockSpec((tm, obs_dim), lambda i: (i, 0)),   # next_states rows
                _wspec(w1sd), _wspec(w1a), _wspec(w1nd),
                _wspec(b1r), _wspec(w2c), _wspec(b2r),
                _wspec(w3r), _wspec(b3r),
            ],
            out_specs=pl.BlockSpec((tm, 1), lambda i: (i, 0)),
        ),
        compiler_params=pltpu.CompilerParams(
            dimension_semantics=("parallel",),
            vmem_limit_bytes=_VMEM_LIMIT,
        ),
    )(s2, a2, ns2, w1sd, w1a, w1nd, b1r, w2c, b2r, w3r, b3r)

    return out.reshape(B, T, 1)


def init_reward_model_params(key, obs_dim, act_dim, hidden=32):
    """Deterministic init of the Reward_Model MLP parameters."""
    d_in = obs_dim * 2 + act_dim
    k1, k2, k3 = jax.random.split(key, 3)
    scale = lambda fan_in: 1.0 / jnp.sqrt(jnp.float32(fan_in))
    w1 = jax.random.uniform(k1, (d_in, hidden), jnp.float32, -1, 1) * scale(d_in)
    b1 = jnp.zeros((1, hidden), jnp.float32)
    w2 = jax.random.uniform(k2, (hidden, hidden), jnp.float32, -1, 1) * scale(hidden)
    b2 = jnp.zeros((1, hidden), jnp.float32)
    w3 = jax.random.uniform(k3, (hidden, 1), jnp.float32, -1, 1) * scale(hidden)
    b3 = jnp.zeros((1, 1), jnp.float32)
    return (w1, b1, w2, b2, w3, b3)


def _reference_forward(states, actions, next_states, params):
    """Pure-JAX reference mirroring the PyTorch module."""
    w1, b1, w2, b2, w3, b3 = params
    x = jnp.concatenate([states, actions, states - next_states], axis=-1)
    h = jnp.maximum(x @ w1 + b1, 0.0)
    h = jnp.maximum(h @ w2 + b2, 0.0)
    return h @ w3 + b3


if __name__ == "__main__":
    # Small mujoco-like shapes: batch=2, seq=8, obs_dim=11, action_dim=3, hidden=32.
    B, T, OBS, ACT, HID = 2, 8, 11, 3, 32

    key = jax.random.PRNGKey(0)
    k_s, k_a, k_ns, k_p = jax.random.split(key, 4)
    states = jax.random.normal(k_s, (B, T, OBS), jnp.float32)
    actions = jax.random.normal(k_a, (B, T, ACT), jnp.float32)
    next_states = jax.random.normal(k_ns, (B, T, OBS), jnp.float32)
    params = init_reward_model_params(k_p, OBS, ACT, HID)

    ref = _reference_forward(states, actions, next_states, params)

    # 1) f32 streaming path -- bit-accurate check against the reference.
    fwd_f32 = jax.jit(functools.partial(rd_reward_decomposer_forward,
                                        compute_dtype=jnp.float32))
    out_f32 = jax.block_until_ready(fwd_f32(states, actions, next_states, params))
    assert out_f32.shape == (B, T, 1), out_f32.shape
    assert jnp.allclose(out_f32, ref, atol=1e-5, rtol=1e-5), "f32 mismatch vs reference"

    # 2) default bf16-streaming path -- loose tolerance (bf16 input quantisation).
    fwd_bf16 = jax.jit(rd_reward_decomposer_forward)
    out_bf16 = jax.block_until_ready(fwd_bf16(states, actions, next_states, params))
    assert out_bf16.shape == (B, T, 1), out_bf16.shape
    assert jnp.allclose(out_bf16, ref, atol=5e-2, rtol=5e-2), "bf16 mismatch vs reference"

    # 3) multi-step ragged grid (N not a multiple of the row tile).
    B2, T2 = 3, 1000
    s_l = jax.random.normal(k_s, (B2, T2, OBS), jnp.float32)
    a_l = jax.random.normal(k_a, (B2, T2, ACT), jnp.float32)
    ns_l = jax.random.normal(k_ns, (B2, T2, OBS), jnp.float32)
    fwd_rag = jax.jit(functools.partial(rd_reward_decomposer_forward,
                                        compute_dtype=jnp.float32, row_tile=512))
    out_rag = jax.block_until_ready(fwd_rag(s_l, a_l, ns_l, params))
    ref_rag = _reference_forward(s_l, a_l, ns_l, params)
    assert out_rag.shape == (B2, T2, 1), out_rag.shape
    assert jnp.allclose(out_rag, ref_rag, atol=1e-5, rtol=1e-5), "ragged-grid mismatch"

    print("KERNEL_OK")
</pallas_src>

<mosaic_0001>
module attributes {stable_mosaic.version = 11 : i64} {
  func.func @_reward_mlp_kernel(%arg0: i32, %arg1: memref<256x11xf32, #tpu.memory_space<vmem>>, %arg2: memref<256x3xf32, #tpu.memory_space<vmem>>, %arg3: memref<256x11xf32, #tpu.memory_space<vmem>>, %arg4: memref<11x32xf32, #tpu.memory_space<vmem>>, %arg5: memref<3x32xf32, #tpu.memory_space<vmem>>, %arg6: memref<11x32xf32, #tpu.memory_space<vmem>>, %arg7: memref<1x32xf32, #tpu.memory_space<vmem>>, %arg8: memref<32x32xf32, #tpu.memory_space<vmem>>, %arg9: memref<1x32xf32, #tpu.memory_space<vmem>>, %arg10: memref<1x32xf32, #tpu.memory_space<vmem>>, %arg11: memref<1x1xf32, #tpu.memory_space<vmem>>, %arg12: memref<256x1xf32, #tpu.memory_space<vmem>>) attributes {dimension_semantics = [#tpu.dimension_semantics<parallel>], iteration_bounds = array<i64: 1>, scalar_prefetch = 0 : i64, scratch_operands = 0 : i64, tpu.core_type = #tpu.core_type<tc>, window_params = [{transform_indices = @transform_0, window_bounds = array<i64: 256, 11>}, {transform_indices = @transform_1, window_bounds = array<i64: 256, 3>}, {transform_indices = @transform_2, window_bounds = array<i64: 256, 11>}, {pipeline_mode = #tpu.pipeline_mode<synchronous>, transform_indices = @transform_3, window_bounds = array<i64: 11, 32>}, {pipeline_mode = #tpu.pipeline_mode<synchronous>, transform_indices = @transform_4, window_bounds = array<i64: 3, 32>}, {pipeline_mode = #tpu.pipeline_mode<synchronous>, transform_indices = @transform_5, window_bounds = array<i64: 11, 32>}, {pipeline_mode = #tpu.pipeline_mode<synchronous>, transform_indices = @transform_6, window_bounds = array<i64: 1, 32>}, {pipeline_mode = #tpu.pipeline_mode<synchronous>, transform_indices = @transform_7, window_bounds = array<i64: 32, 32>}, {pipeline_mode = #tpu.pipeline_mode<synchronous>, transform_indices = @transform_8, window_bounds = array<i64: 1, 32>}, {pipeline_mode = #tpu.pipeline_mode<synchronous>, transform_indices = @transform_9, window_bounds = array<i64: 1, 32>}, {pipeline_mode = #tpu.pipeline_mode<synchronous>, transform_indices = @transform_10, window_bounds = array<i64: 1, 1>}, {transform_indices = @transform_11, window_bounds = array<i64: 256, 1>}]} {
    %c0 = arith.constant 0 : index
    %c0_0 = arith.constant 0 : index
    %0 = vector.load %arg1[%c0, %c0_0] : memref<256x11xf32, #tpu.memory_space<vmem>>, vector<256x11xf32>
    %c0_1 = arith.constant 0 : index
    %c0_2 = arith.constant 0 : index
    %1 = vector.load %arg4[%c0_1, %c0_2] : memref<11x32xf32, #tpu.memory_space<vmem>>, vector<11x32xf32>
    %cst = arith.constant dense<0.000000e+00> : vector<256x32xf32>
    %2 = tpu.matmul %0, %1, %cst {dimension_numbers = #tpu.dot_dimension_numbers<[1], [0], [0], [1], [0, 0, 1, 1], [], []>} : vector<256x11xf32>, vector<11x32xf32>, vector<256x32xf32> -> vector<256x32xf32>
    %c0_3 = arith.constant 0 : index
    %c0_4 = arith.constant 0 : index
    %3 = vector.load %arg2[%c0_3, %c0_4] : memref<256x3xf32, #tpu.memory_space<vmem>>, vector<256x3xf32>
    %c0_5 = arith.constant 0 : index
    %c0_6 = arith.constant 0 : index
    %4 = vector.load %arg5[%c0_5, %c0_6] : memref<3x32xf32, #tpu.memory_space<vmem>>, vector<3x32xf32>
    %cst_7 = arith.constant dense<0.000000e+00> : vector<256x32xf32>
    %5 = tpu.matmul %3, %4, %cst_7 {dimension_numbers = #tpu.dot_dimension_numbers<[1], [0], [0], [1], [0, 0, 1, 1], [], []>} : vector<256x3xf32>, vector<3x32xf32>, vector<256x32xf32> -> vector<256x32xf32>
    %6 = arith.addf %2, %5 : vector<256x32xf32>
    %c0_8 = arith.constant 0 : index
    %c0_9 = arith.constant 0 : index
    %7 = vector.load %arg3[%c0_8, %c0_9] : memref<256x11xf32, #tpu.memory_space<vmem>>, vector<256x11xf32>
    %c0_10 = arith.constant 0 : index
    %c0_11 = arith.constant 0 : index
    %8 = vector.load %arg6[%c0_10, %c0_11] : memref<11x32xf32, #tpu.memory_space<vmem>>, vector<11x32xf32>
    %cst_12 = arith.constant dense<0.000000e+00> : vector<256x32xf32>
    %9 = tpu.matmul %7, %8, %cst_12 {dimension_numbers = #tpu.dot_dimension_numbers<[1], [0], [0], [1], [0, 0, 1, 1], [], []>} : vector<256x11xf32>, vector<11x32xf32>, vector<256x32xf32> -> vector<256x32xf32>
    %10 = arith.addf %6, %9 : vector<256x32xf32>
    %c0_13 = arith.constant 0 : index
    %c0_14 = arith.constant 0 : index
    %11 = vector.load %arg7[%c0_13, %c0_14] : memref<1x32xf32, #tpu.memory_space<vmem>>, vector<1x32xf32>
    %12 = vector.broadcast %11 : vector<1x32xf32> to vector<256x32xf32>
    %13 = arith.addf %10, %12 : vector<256x32xf32>
    %cst_15 = arith.constant 0.000000e+00 : f32
    %14 = vector.broadcast %cst_15 : f32 to vector<256x32xf32>
    %15 = arith.maximumf %13, %14 : vector<256x32xf32>
    %c0_16 = arith.constant 0 : index
    %c0_17 = arith.constant 0 : index
    %16 = vector.load %arg8[%c0_16, %c0_17] : memref<32x32xf32, #tpu.memory_space<vmem>>, vector<32x32xf32>
    %cst_18 = arith.constant dense<0.000000e+00> : vector<256x32xf32>
    %17 = tpu.matmul %15, %16, %cst_18 {dimension_numbers = #tpu.dot_dimension_numbers<[1], [0], [0], [1], [0, 0, 1, 1], [], []>} : vector<256x32xf32>, vector<32x32xf32>, vector<256x32xf32> -> vector<256x32xf32>
    %c0_19 = arith.constant 0 : index
    %c0_20 = arith.constant 0 : index
    %18 = vector.load %arg9[%c0_19, %c0_20] : memref<1x32xf32, #tpu.memory_space<vmem>>, vector<1x32xf32>
    %19 = vector.broadcast %18 : vector<1x32xf32> to vector<256x32xf32>
    %20 = arith.addf %17, %19 : vector<256x32xf32>
    %cst_21 = arith.constant 0.000000e+00 : f32
    %21 = vector.broadcast %cst_21 : f32 to vector<256x32xf32>
    %22 = arith.maximumf %20, %21 : vector<256x32xf32>
    %c0_22 = arith.constant 0 : index
    %c0_23 = arith.constant 0 : index
    %23 = vector.load %arg10[%c0_22, %c0_23] : memref<1x32xf32, #tpu.memory_space<vmem>>, vector<1x32xf32>
    %24 = vector.broadcast %23 : vector<1x32xf32> to vector<256x32xf32>
    %25 = arith.mulf %22, %24 : vector<256x32xf32>
    %cst_24 = arith.constant dense<0.000000e+00> : vector<256xf32>
    %26 = vector.multi_reduction <add>, %25, %cst_24 [1] : vector<256x32xf32> to vector<256xf32>
    %27 = vector.shape_cast %26 : vector<256xf32> to vector<256x1xf32>
    %c0_25 = arith.constant 0 : index
    %c0_26 = arith.constant 0 : index
    %28 = vector.load %arg11[%c0_25, %c0_26] : memref<1x1xf32, #tpu.memory_space<vmem>>, vector<1x1xf32>
    %29 = vector.broadcast %28 : vector<1x1xf32> to vector<256x1xf32>
    %30 = arith.addf %27, %29 : vector<256x1xf32>
    %c0_27 = arith.constant 0 : index
    %c0_28 = arith.constant 0 : index
    %31 = vector.load %arg12[%c0_27, %c0_28] : memref<256x1xf32, #tpu.memory_space<vmem>>, vector<256x1xf32>
    tpu.vector_store %arg12[%c0_27, %c0_28], %30 {strides = array<i32>} : memref<256x1xf32, #tpu.memory_space<vmem>>, vector<256x1xf32>,
    return
  }
  func.func @transform_0(%arg0: i32) -> (i32, i32) {
    %c0_i32 = arith.constant 0 : i32
    %c0_i32_0 = arith.constant 0 : i32
    return %arg0, %c0_i32 : i32, i32
  }
  func.func @transform_1(%arg0: i32) -> (i32, i32) {
    %c0_i32 = arith.constant 0 : i32
    %c0_i32_0 = arith.constant 0 : i32
    return %arg0, %c0_i32 : i32, i32
  }
  func.func @transform_2(%arg0: i32) -> (i32, i32) {
    %c0_i32 = arith.constant 0 : i32
    %c0_i32_0 = arith.constant 0 : i32
    return %arg0, %c0_i32 : i32, i32
  }
  func.func @transform_3(%arg0: i32) -> (i32, i32) {
    %c0_i32 = arith.constant 0 : i32
    %c0_i32_0 = arith.constant 0 : i32
    %c0_i32_1 = arith.constant 0 : i32
    return %c0_i32, %c0_i32_0 : i32, i32
  }
  func.func @transform_4(%arg0: i32) -> (i32, i32) {
    %c0_i32 = arith.constant 0 : i32
    %c0_i32_0 = arith.constant 0 : i32
    %c0_i32_1 = arith.constant 0 : i32
    return %c0_i32, %c0_i32_0 : i32, i32
  }
  func.func @transform_5(%arg0: i32) -> (i32, i32) {
    %c0_i32 = arith.constant 0 : i32
    %c0_i32_0 = arith.constant 0 : i32
    %c0_i32_1 = arith.constant 0 : i32
    return %c0_i32, %c0_i32_0 : i32, i32
  }
  func.func @transform_6(%arg0: i32) -> (i32, i32) {
    %c0_i32 = arith.constant 0 : i32
    %c0_i32_0 = arith.constant 0 : i32
    %c0_i32_1 = arith.constant 0 : i32
    return %c0_i32, %c0_i32_0 : i32, i32
  }
  func.func @transform_7(%arg0: i32) -> (i32, i32) {
    %c0_i32 = arith.constant 0 : i32
    %c0_i32_0 = arith.constant 0 : i32
    %c0_i32_1 = arith.constant 0 : i32
    return %c0_i32, %c0_i32_0 : i32, i32
  }
  func.func @transform_8(%arg0: i32) -> (i32, i32) {
    %c0_i32 = arith.constant 0 : i32
    %c0_i32_0 = arith.constant 0 : i32
    %c0_i32_1 = arith.constant 0 : i32
    return %c0_i32, %c0_i32_0 : i32, i32
  }
  func.func @transform_9(%arg0: i32) -> (i32, i32) {
    %c0_i32 = arith.constant 0 : i32
    %c0_i32_0 = arith.constant 0 : i32
    %c0_i32_1 = arith.constant 0 : i32
    return %c0_i32, %c0_i32_0 : i32, i32
  }
  func.func @transform_10(%arg0: i32) -> (i32, i32) {
    %c0_i32 = arith.constant 0 : i32
    %c0_i32_0 = arith.constant 0 : i32
    %c0_i32_1 = arith.constant 0 : i32
    return %c0_i32, %c0_i32_0 : i32, i32
  }
  func.func @transform_11(%arg0: i32) -> (i32, i32) {
    %c0_i32 = arith.constant 0 : i32
    %c0_i32_0 = arith.constant 0 : i32
    return %arg0, %c0_i32 : i32, i32
  }
}

</mosaic_0001>

<bundles_post_ra>
// kernel: rd_reward_decomposer_forward.1
= control target key start
LH: loop header
LB: loop body
LE: loop exit
PB: predicated region body
PF: predicated region fallthrough
CT: control target
= control target key end

     0   :  { %s3108_s0 = inlined_call_operand.vmem [shape: f32[16,11], index: 0, kind: input, shape index: {}]   ;;  %s3109_s1 = inlined_call_operand.vmem [shape: f32[16,3], index: 1, kind: input, shape index: {}]   ;;  %s3110_s2 = inlined_call_operand.vmem [shape: f32[16,11], index: 2, kind: input, shape index: {}]   ;;  %s3111_s3 = inlined_call_operand.vmem [shape: f32[11,32], index: 3, kind: input, shape index: {}]   ;;  %s3112_s4 = inlined_call_operand.vmem [shape: f32[3,32], index: 4, kind: input, shape index: {}]   ;;  %s3113_s5 = inlined_call_operand.vmem [shape: f32[11,32], index: 5, kind: input, shape index: {}]   ;;  %s3114_s6 = inlined_call_operand.vmem [shape: f32[1,32], index: 6, kind: input, shape index: {}]   ;;  %s3115_s7 = inlined_call_operand.vmem [shape: f32[32,32], index: 7, kind: input, shape index: {}]   ;;  %s3116_s8 = inlined_call_operand.vmem [shape: f32[1,32], index: 8, kind: input, shape index: {}]   ;;  %s3117_s9 = inlined_call_operand.vmem [shape: f32[1,32], index: 9, kind: input, shape index: {}]   ;;  %s3118_s10 = inlined_call_operand.<no memory space> [shape: f32[1,1], index: 10, kind: input, shape index: {}]   ;;  %s3119_s11 = inlined_call_operand.vmem [shape: f32[16,1], index: 11, kind: output, shape index: {}]  }
   0x1   :  { %v16_v0 = vstv %s3118_s10 }
   0x2   :  { %17 = vst [vmem:[#allocation2] sm:$0x1] %v16_v0 }
   0x3   :  { %v106_v1 = vld [vmem:[%s3112_s4] sm:$0x7]  ;;  %vm204_vm0 = vcmask 1042432   ;;  %v73_v2 = vld [vmem:[%s3111_s3 + $0x8] sm:$0x7]  ;;  %vm107_vm1 = vcmask 23552  }
   0x4   :  { %v74_v3 = vld [vmem:[%s3109_s1] sm:$0xff]  ;;  %2108 = vmatprep.subr.msk.mxu0 %vm204_vm0, %v106_v1  ;;  %2158 = vmatprep.subr.msk.mxu1 %vm204_vm0, %v73_v2  ;;  %v75_v4 = vld [vmem:[%s3109_s1 + $0x8] sm:$0xff]  ;;  %vm433_vm2 = vcmask 89088   ;;  %v76_v9 = vld [vmem:[%s3109_s1 + $0x10] sm:$0xff]  ;;  %vm1230_vm3 = vcmask 261120   ;;  %vm1758_vm4 = vcmask 7168  }
   0x5   :  { %v72_v5 = vld [vmem:[%s3111_s3] sm:$0xff]  ;;  %v791_v6 = vld [vmem:[%s3113_s5 + $0x8] sm:$0x7]  ;;  %2109 = vmatpush3.msk.msra.mxu0 %vm204_vm0, %v106_v1  ;;  %2110 = vmatprep.mubr.msk.f32.mxu0 %vm107_vm1, %v74_v3  ;;  %v42_v10 = vld [vmem:[%s3108_s0 + $0x10] sm:$0xff] }
   0x6   :  { %v40_v7 = vld [vmem:[%s3108_s0] sm:$0xff]  ;;  %2159 = vmatpush3.msk.msra.mxu1 %vm204_vm0, %v73_v2  ;;  %2111 = vmatmul.mubr.msk.f32.vlgmr.msra.gmra.mxu0 %vm107_vm1, %v75_v4  ;;  %v41_v8 = vld [vmem:[%s3108_s0 + $0x8] sm:$0xff]  ;;  %v77_v11 = vld [vmem:[%s3109_s1 + $0x18] sm:$0xff] }
   0x7   :  { %2160 = vmatprep.subr.mxu1 %v72_v5  ;;  %2210 = vmatprep.subr.msk.mxu0 %vm204_vm0, %v791_v6  ;;  %v78_v12 = vld [vmem:[%s3109_s1 + $0x20] sm:$0xff]  ;;  %v43_v13 = vld [vmem:[%s3108_s0 + $0x18] sm:$0xff]  ;;  %v79_v15 = vld [vmem:[%s3109_s1 + $0x28] sm:$0xff] }
   0x8   :  { %2161 = vmatpush3.msra.mxu1 %v72_v5  ;;  %2162 = vmatprep.mubr.msk.f32.mxu1 %vm433_vm2, %v40_v7  ;;  %v44_v14 = vld [vmem:[%s3108_s0 + $0x20] sm:$0xff]  ;;  %v80_v16 = vld [vmem:[%s3109_s1 + $0x30] sm:$0xff]  ;;  %v45_v17 = vld [vmem:[%s3108_s0 + $0x28] sm:$0xff] }
   0x9   :  { %2211 = vmatpush3.msk.msra.mxu0 %vm204_vm0, %v791_v6  ;;  %2163 = vmatmul.mubr.msk.f32.vlgmr.msra.gmra.mxu1 %vm433_vm2, %v41_v8  ;;  %v46_v18 = vld [vmem:[%s3108_s0 + $0x30] sm:$0xff]  ;;  %v790_v19 = vld [vmem:[%s3113_s5] sm:$0xff]  ;;  %v81_v20 = vld [vmem:[%s3109_s1 + $0x38] sm:$0xff] }
   0xa   :  { %2113 = vmatprep.mubr.msk.f32.mxu0 %vm107_vm1, %v76_v9  ;;  %2165 = vmatprep.mubr.msk.f32.mxu1 %vm433_vm2, %v42_v10  ;;  %v82_v21 = vld [vmem:[%s3109_s1 + $0x40] sm:$0xff]  ;;  %v47_v22 = vld [vmem:[%s3108_s0 + $0x38] sm:$0xff]  ;;  %v83_v24 = vld [vmem:[%s3109_s1 + $0x48] sm:$0xff] }
   0xb   :  { %2114 = vmatmul.mubr.msk.f32.gmra.mxu0 %vm107_vm1, %v77_v11  ;;  %2212 = vmatprep.subr.mxu0 %v790_v19  ;;  %v48_v23 = vld [vmem:[%s3108_s0 + $0x40] sm:$0xff]  ;;  %v84_v25 = vld [vmem:[%s3109_s1 + $0x50] sm:$0xff]  ;;  %v49_v26 = vld [vmem:[%s3108_s0 + $0x48] sm:$0xff] }
   0xc   :  { %2116 = vmatprep.mubr.msk.f32.mxu0 %vm107_vm1, %v78_v12  ;;  %2213 = vmatpush3.msra.mxu0 %v790_v19  ;;  %v50_v27 = vld [vmem:[%s3108_s0 + $0x50] sm:$0xff]  ;;  %v85_v28 = vld [vmem:[%s3109_s1 + $0x58] sm:$0xff]  ;;  %v86_v29 = vld [vmem:[%s3109_s1 + $0x60] sm:$0xff] }
   0xd   :  { %2166 = vmatmul.mubr.msk.f32.gmra.mxu1 %vm433_vm2, %v43_v13  ;;  %v51_v30 = vld [vmem:[%s3108_s0 + $0x58] sm:$0xff]  ;;  %v52_v31 = vld [vmem:[%s3108_s0 + $0x60] sm:$0xff]  ;;  %v87_v32 = vld [vmem:[%s3109_s1 + $0x68] sm:$0xff] }
   0xe   :  { %2168 = vmatprep.mubr.msk.f32.mxu1 %vm433_vm2, %v44_v14  ;;  %v88_v33 = vld [vmem:[%s3109_s1 + $0x70] sm:$0xff]  ;;  %v53_v34 = vld [vmem:[%s3108_s0 + $0x68] sm:$0xff]  ;;  %v89_v36 = vld [vmem:[%s3109_s1 + $0x78] sm:$0xff] }
   0xf   :  { %2117 = vmatmul.mubr.msk.f32.gmra.mxu0 %vm107_vm1, %v79_v15  ;;  %v54_v35 = vld [vmem:[%s3108_s0 + $0x70] sm:$0xff]  ;;  %v90_v37 = vld [vmem:[%s3109_s1 + $0x80] sm:$0xff]  ;;  %v55_v38 = vld [vmem:[%s3108_s0 + $0x78] sm:$0xff] }
  0x10   :  { %2119 = vmatprep.mubr.msk.f32.mxu0 %vm107_vm1, %v80_v16  ;;  %v56_v39 = vld [vmem:[%s3108_s0 + $0x80] sm:$0xff]  ;;  %v91_v40 = vld [vmem:[%s3109_s1 + $0x88] sm:$0xff]  ;;  %v92_v41 = vld [vmem:[%s3109_s1 + $0x90] sm:$0xff] }
  0x11   :  { %2169 = vmatmul.mubr.msk.f32.gmra.mxu1 %vm433_vm2, %v45_v17  ;;  %v57_v42 = vld [vmem:[%s3108_s0 + $0x88] sm:$0xff]  ;;  %v58_v43 = vld [vmem:[%s3108_s0 + $0x90] sm:$0xff]  ;;  %v93_v44 = vld [vmem:[%s3109_s1 + $0x98] sm:$0xff] }
  0x12   :  { %2171 = vmatprep.mubr.msk.f32.mxu1 %vm433_vm2, %v46_v18  ;;  %v94_v45 = vld [vmem:[%s3109_s1 + $0xa0] sm:$0xff]  ;;  %v59_v46 = vld [vmem:[%s3108_s0 + $0x98] sm:$0xff]  ;;  %v95_v48 = vld [vmem:[%s3109_s1 + $0xa8] sm:$0xff] }
  0x13   :  { %2120 = vmatmul.mubr.msk.f32.gmra.mxu0 %vm107_vm1, %v81_v20  ;;  %v60_v47 = vld [vmem:[%s3108_s0 + $0xa0] sm:$0xff]  ;;  %v96_v49 = vld [vmem:[%s3109_s1 + $0xb0] sm:$0xff]  ;;  %v61_v50 = vld [vmem:[%s3108_s0 + $0xa8] sm:$0xff] }
  0x14   :  { %2122 = vmatprep.mubr.msk.f32.mxu0 %vm107_vm1, %v82_v21  ;;  %v62_v51 = vld [vmem:[%s3108_s0 + $0xb0] sm:$0xff]  ;;  %v97_v52 = vld [vmem:[%s3109_s1 + $0xb8] sm:$0xff]  ;;  %v98_v53 = vld [vmem:[%s3109_s1 + $0xc0] sm:$0xff] }
  0x15   :  { %2172 = vmatmul.mubr.msk.f32.gmra.mxu1 %vm433_vm2, %v47_v22  ;;  %v63_v54 = vld [vmem:[%s3108_s0 + $0xb8] sm:$0xff]  ;;  %v64_v55 = vld [vmem:[%s3108_s0 + $0xc0] sm:$0xff]  ;;  %v99_v56 = vld [vmem:[%s3109_s1 + $0xc8] sm:$0xff] }
  0x16   :  { %2174 = vmatprep.mubr.msk.f32.mxu1 %vm433_vm2, %v48_v23  ;;  %v100_v57 = vld [vmem:[%s3109_s1 + $0xd0] sm:$0xff]  ;;  %v65_v58 = vld [vmem:[%s3108_s0 + $0xc8] sm:$0xff]  ;;  %v101_v60 = vld [vmem:[%s3109_s1 + $0xd8] sm:$0xff] }
  0x17   :  { %2123 = vmatmul.mubr.msk.f32.gmra.mxu0 %vm107_vm1, %v83_v24  ;;  %v66_v59 = vld [vmem:[%s3108_s0 + $0xd0] sm:$0xff]  ;;  %v102_v61 = vld [vmem:[%s3109_s1 + $0xe0] sm:$0xff]  ;;  %v67_v62 = vld [vmem:[%s3108_s0 + $0xd8] sm:$0xff] }
  0x18   :  { %2125 = vmatprep.mubr.msk.f32.mxu0 %vm107_vm1, %v84_v25  ;;  %v68_v63 = vld [vmem:[%s3108_s0 + $0xe0] sm:$0xff]  ;;  %v103_v0 = vld [vmem:[%s3109_s1 + $0xe8] sm:$0xff]  ;;  %v104_v1 = vld [vmem:[%s3109_s1 + $0xf0] sm:$0xff] }
  0x19   :  { %2175 = vmatmul.mubr.msk.f32.gmra.mxu1 %vm433_vm2, %v49_v26  ;;  %v69_v2 = vld [vmem:[%s3108_s0 + $0xe8] sm:$0xff]  ;;  %v70_v3 = vld [vmem:[%s3108_s0 + $0xf0] sm:$0xff]  ;;  %v105_v4 = vld [vmem:[%s3109_s1 + $0xf8] sm:$0xff] }
  0x1a   :  { %2177 = vmatprep.mubr.msk.f32.mxu1 %vm433_vm2, %v50_v27  ;;  %v758_v5 = vld [vmem:[%s3110_s2] sm:$0xff]  ;;  %v71_v6 = vld [vmem:[%s3108_s0 + $0xf8] sm:$0xff]  ;;  %v759_v7 = vld [vmem:[%s3110_s2 + $0x8] sm:$0xff] }
  0x1b   :  { %2126 = vmatmul.mubr.msk.f32.gmra.mxu0 %vm107_vm1, %v85_v28  ;;  %v760_v8 = vld [vmem:[%s3110_s2 + $0x10] sm:$0xff]  ;;  %v761_v9 = vld [vmem:[%s3110_s2 + $0x18] sm:$0xff]  ;;  %v762_v10 = vld [vmem:[%s3110_s2 + $0x20] sm:$0xff] }
  0x1c   :  { %2128 = vmatprep.mubr.msk.f32.mxu0 %vm107_vm1, %v86_v29  ;;  %v763_v11 = vld [vmem:[%s3110_s2 + $0x28] sm:$0xff]  ;;  %v764_v12 = vld [vmem:[%s3110_s2 + $0x30] sm:$0xff]  ;;  %v765_v13 = vld [vmem:[%s3110_s2 + $0x38] sm:$0xff] }
  0x1d   :  { %2178 = vmatmul.mubr.msk.f32.gmra.mxu1 %vm433_vm2, %v51_v30  ;;  %v766_v14 = vld [vmem:[%s3110_s2 + $0x40] sm:$0xff]  ;;  %v1222_v15 = vld [vmem:[%s3115_s7 + $0x18] sm:$0xff]  ;;  %v767_v16 = vld [vmem:[%s3110_s2 + $0x48] sm:$0xff] }
  0x1e   :  { %2180 = vmatprep.mubr.msk.f32.mxu1 %vm433_vm2, %v52_v31  ;;  %2262 = vmatprep.subr.mxu1 %v1222_v15  ;;  %v768_v17 = vld [vmem:[%s3110_s2 + $0x50] sm:$0xff]  ;;  %v769_v18 = vld [vmem:[%s3110_s2 + $0x58] sm:$0xff]  ;;  %v770_v19 = vld [vmem:[%s3110_s2 + $0x60] sm:$0xff] }
  0x1f   :  { %2129 = vmatmul.mubr.msk.f32.gmra.mxu0 %vm107_vm1, %v87_v32  ;;  %2263 = vmatpush3.msra.mxu1 %v1222_v15  ;;  %v771_v20 = vld [vmem:[%s3110_s2 + $0x68] sm:$0xff]  ;;  %v772_v21 = vld [vmem:[%s3110_s2 + $0x70] sm:$0xff]  ;;  %v773_v22 = vld [vmem:[%s3110_s2 + $0x78] sm:$0xff] }
  0x20   :  { %2131 = vmatprep.mubr.msk.f32.mxu0 %vm107_vm1, %v88_v33  ;;  %v774_v23 = vld [vmem:[%s3110_s2 + $0x80] sm:$0xff]  ;;  %v1221_v24 = vld [vmem:[%s3115_s7 + $0x10] sm:$0xff]  ;;  %v775_v25 = vld [vmem:[%s3110_s2 + $0x88] sm:$0xff] }
  0x21   :  { %2181 = vmatmul.mubr.msk.f32.gmra.mxu1 %vm433_vm2, %v53_v34  ;;  %2264 = vmatprep.subr.mxu1 %v1221_v24  ;;  %v776_v26 = vld [vmem:[%s3110_s2 + $0x90] sm:$0xff]  ;;  %v777_v27 = vld [vmem:[%s3110_s2 + $0x98] sm:$0xff]  ;;  %v778_v28 = vld [vmem:[%s3110_s2 + $0xa0] sm:$0xff] }
  0x22   :  { %2183 = vmatprep.mubr.msk.f32.mxu1 %vm433_vm2, %v54_v35  ;;  %2265 = vmatpush3.msra.mxu1 %v1221_v24  ;;  %v779_v29 = vld [vmem:[%s3110_s2 + $0xa8] sm:$0xff]  ;;  %v780_v30 = vld [vmem:[%s3110_s2 + $0xb0] sm:$0xff]  ;;  %v781_v31 = vld [vmem:[%s3110_s2 + $0xb8] sm:$0xff] }
  0x23   :  { %2132 = vmatmul.mubr.msk.f32.gmra.mxu0 %vm107_vm1, %v89_v36  ;;  %v782_v32 = vld [vmem:[%s3110_s2 + $0xc0] sm:$0xff]  ;;  %v1220_v33 = vld [vmem:[%s3115_s7 + $0x8] sm:$0xff]  ;;  %v784_v35 = vld [vmem:[%s3110_s2 + $0xd0] sm:$0xff] }
  0x24   :  { %2134 = vmatprep.mubr.msk.f32.mxu0 %vm107_vm1, %v90_v37  ;;  %2266 = vmatprep.subr.mxu1 %v1220_v33  ;;  %v783_v34 = vld [vmem:[%s3110_s2 + $0xc8] sm:$0xff]  ;;  %v785_v36 = vld [vmem:[%s3110_s2 + $0xd8] sm:$0xff]  ;;  %v786_v37 = vld [vmem:[%s3110_s2 + $0xe0] sm:$0xff] }
  0x25   :  { %2184 = vmatmul.mubr.msk.f32.gmra.mxu1 %vm433_vm2, %v55_v38  ;;  %v787_v38 = vld [vmem:[%s3110_s2 + $0xe8] sm:$0xff] }
  0x26   :  { %2186 = vmatprep.mubr.msk.f32.mxu1 %vm433_vm2, %v56_v39  ;;  %2267 = vmatpush3.msra.mxu1 %v1220_v33  ;;  %v788_v39 = vld [vmem:[%s3110_s2 + $0xf0] sm:$0xff] }
  0x27   :  { %2135 = vmatmul.mubr.msk.f32.gmra.mxu0 %vm107_vm1, %v91_v40  ;;  %v789_v40 = vld [vmem:[%s3110_s2 + $0xf8] sm:$0xff] }
  0x28   :  { %2137 = vmatprep.mubr.msk.f32.mxu0 %vm107_vm1, %v92_v41  ;;  %v1219_v41 = vld [vmem:[%s3115_s7] sm:$0xff] }
  0x29   :  { %2187 = vmatmul.mubr.msk.f32.gmra.mxu1 %vm433_vm2, %v57_v42  ;;  %2268 = vmatprep.subr.mxu1 %v1219_v41 }
  0x2a   :  { %2189 = vmatprep.mubr.msk.f32.mxu1 %vm433_vm2, %v58_v43  ;;  %2269 = vmatpush3.msra.mxu1 %v1219_v41 }
  0x2b   :  { %2138 = vmatmul.mubr.msk.f32.gmra.mxu0 %vm107_vm1, %v93_v44 }
  0x2c   :  { %2140 = vmatprep.mubr.msk.f32.mxu0 %vm107_vm1, %v94_v45 }
  0x2d   :  { %2190 = vmatmul.mubr.msk.f32.gmra.mxu1 %vm433_vm2, %v59_v46 }
  0x2e   :  { %2192 = vmatprep.mubr.msk.f32.mxu1 %vm433_vm2, %v60_v47 }
  0x2f   :  { %2141 = vmatmul.mubr.msk.f32.gmra.mxu0 %vm107_vm1, %v95_v48 }
  0x30   :  { %2143 = vmatprep.mubr.msk.f32.mxu0 %vm107_vm1, %v96_v49 }
  0x31   :  { %2193 = vmatmul.mubr.msk.f32.gmra.mxu1 %vm433_vm2, %v61_v50 }
  0x32   :  { %2195 = vmatprep.mubr.msk.f32.mxu1 %vm433_vm2, %v62_v51 }
  0x33   :  { %2144 = vmatmul.mubr.msk.f32.gmra.mxu0 %vm107_vm1, %v97_v52 }
  0x34   :  { %2146 = vmatprep.mubr.msk.f32.mxu0 %vm107_vm1, %v98_v53 }
  0x35   :  { %2196 = vmatmul.mubr.msk.f32.gmra.mxu1 %vm433_vm2, %v63_v54 }
  0x36   :  { %2198 = vmatprep.mubr.msk.f32.mxu1 %vm433_vm2, %v64_v55 }
  0x37   :  { %2147 = vmatmul.mubr.msk.f32.gmra.mxu0 %vm107_vm1, %v99_v56 }
  0x38   :  { %2149 = vmatprep.mubr.msk.f32.mxu0 %vm107_vm1, %v100_v57 }
  0x39   :  { %2199 = vmatmul.mubr.msk.f32.gmra.mxu1 %vm433_vm2, %v65_v58 }
  0x3a   :  { %2201 = vmatprep.mubr.msk.f32.mxu1 %vm433_vm2, %v66_v59 }
  0x3b   :  { %2150 = vmatmul.mubr.msk.f32.gmra.mxu0 %vm107_vm1, %v101_v60 }
  0x3c   :  { %2152 = vmatprep.mubr.msk.f32.mxu0 %vm107_vm1, %v102_v61 }
  0x3d   :  { %2202 = vmatmul.mubr.msk.f32.gmra.mxu1 %vm433_vm2, %v67_v62 }
  0x3e   :  { %2204 = vmatprep.mubr.msk.f32.mxu1 %vm433_vm2, %v68_v63 }
  0x3f   :  { %2153 = vmatmul.mubr.msk.f32.gmra.mxu0 %vm107_vm1, %v103_v0 }
  0x40   :  { %2155 = vmatprep.mubr.msk.f32.mxu0 %vm107_vm1, %v104_v1 }
  0x41   :  { %2205 = vmatmul.mubr.msk.f32.gmra.mxu1 %vm433_vm2, %v69_v2 }
  0x42   :  { %2207 = vmatprep.mubr.msk.f32.mxu1 %vm433_vm2, %v70_v3 }
  0x43   :  { %2156 = vmatmul.mubr.msk.f32.gmra.mxu0 %vm107_vm1, %v105_v4 }
  0x44   :  { %2214 = vmatprep.mubr.msk.f32.mxu0 %vm433_vm2, %v758_v5 }
  0x45   :  { %2208 = vmatmul.mubr.msk.f32.gmra.mxu1 %vm433_vm2, %v71_v6 }
  0x47   :  { %2215 = vmatmul.mubr.msk.f32.vlgmr.msra.gmra.mxu0 %vm433_vm2, %v759_v7 }
  0x48   :  { %2217 = vmatprep.mubr.msk.f32.mxu0 %vm433_vm2, %v760_v8 }
  0x4b   :  { %2218 = vmatmul.mubr.msk.f32.gmra.mxu0 %vm433_vm2, %v761_v9 }
  0x4c   :  { %2220 = vmatprep.mubr.msk.f32.mxu0 %vm433_vm2, %v762_v10 }
  0x4f   :  { %2221 = vmatmul.mubr.msk.f32.gmra.mxu0 %vm433_vm2, %v763_v11 }
  0x50   :  { %2223 = vmatprep.mubr.msk.f32.mxu0 %vm433_vm2, %v764_v12 }
  0x53   :  { %2224 = vmatmul.mubr.msk.f32.gmra.mxu0 %vm433_vm2, %v765_v13 }
  0x54   :  { %2226 = vmatprep.mubr.msk.f32.mxu0 %vm433_vm2, %v766_v14 }
  0x57   :  { %2227 = vmatmul.mubr.msk.f32.gmra.mxu0 %vm433_vm2, %v767_v16 }
  0x58   :  { %2229 = vmatprep.mubr.msk.f32.mxu0 %vm433_vm2, %v768_v17 }
  0x5b   :  { %2230 = vmatmul.mubr.msk.f32.gmra.mxu0 %vm433_vm2, %v769_v18 }
  0x5c   :  { %2232 = vmatprep.mubr.msk.f32.mxu0 %vm433_vm2, %v770_v19 }
  0x5f   :  { %2233 = vmatmul.mubr.msk.f32.gmra.mxu0 %vm433_vm2, %v771_v20 }
  0x60   :  { %2235 = vmatprep.mubr.msk.f32.mxu0 %vm433_vm2, %v772_v21 }
  0x63   :  { %2236 = vmatmul.mubr.msk.f32.gmra.mxu0 %vm433_vm2, %v773_v22 }
  0x64   :  { %2238 = vmatprep.mubr.msk.f32.mxu0 %vm433_vm2, %v774_v23 }
  0x67   :  { %2239 = vmatmul.mubr.msk.f32.gmra.mxu0 %vm433_vm2, %v775_v25 }
  0x68   :  { %2241 = vmatprep.mubr.msk.f32.mxu0 %vm433_vm2, %v776_v26 }
  0x6b   :  { %2242 = vmatmul.mubr.msk.f32.gmra.mxu0 %vm433_vm2, %v777_v27 }
  0x6c   :  { %2244 = vmatprep.mubr.msk.f32.mxu0 %vm433_vm2, %v778_v28 }
  0x6f   :  { %2245 = vmatmul.mubr.msk.f32.gmra.mxu0 %vm433_vm2, %v779_v29 }
  0x70   :  { %2247 = vmatprep.mubr.msk.f32.mxu0 %vm433_vm2, %v780_v30 }
  0x73   :  { %2248 = vmatmul.mubr.msk.f32.gmra.mxu0 %vm433_vm2, %v781_v31  ;;  %v2875_v31 = vld [vmem:[%s3114_s6] ss:$0 sm:$0xff] }
  0x74   :  { %2250 = vmatprep.mubr.msk.f32.mxu0 %vm433_vm2, %v782_v32 }
  0x77   :  { %2251 = vmatmul.mubr.msk.f32.gmra.mxu0 %vm433_vm2, %v783_v34 }
  0x78   :  { %2253 = vmatprep.mubr.msk.f32.mxu0 %vm433_vm2, %v784_v35 }
  0x7b   :  { %2254 = vmatmul.mubr.msk.f32.gmra.mxu0 %vm433_vm2, %v785_v36 }
  0x7c   :  { %2256 = vmatprep.mubr.msk.f32.mxu0 %vm433_vm2, %v786_v37 }
  0x7f   :  { %2257 = vmatmul.mubr.msk.f32.gmra.mxu0 %vm433_vm2, %v787_v38 }
  0x80   :  { %2259 = vmatprep.mubr.msk.f32.mxu0 %vm433_vm2, %v788_v39 }
  0x83   :  { %2260 = vmatmul.mubr.msk.f32.gmra.mxu0 %vm433_vm2, %v789_v40 }
  0xc6   :  { %v2112_v42 = vpop.f32.mrf.mxu0 }
  0xc8   :  { %v274_v43 = vpop.f32.mrf.mxu0 }
  0xc9   :  { %v2164_v44 = vpop.f32.mrf.mxu1 }
  0xca   :  { %v605_v27 = vadd.f32 %v2164_v44, %v2112_v42 }
  0xcb   :  { %v2115_v45 = vpop.f32.mrf.mxu0  ;;  %v599_v46 = vpop.f32.mrf.mxu1 }
  0xcc   :  { %v600_v29 = vadd.f32 %v599_v46, %v274_v43 }
  0xcd   :  { %v284_v47 = vpop.f32.mrf.mxu0  ;;  %v2167_v48 = vpop.f32.mrf.mxu1 }
  0xce   :  { %v615_v34 = vadd.f32 %v2167_v48, %v2115_v45 }
  0xcf   :  { %v2118_v49 = vpop.f32.mrf.mxu0  ;;  %v609_v50 = vpop.f32.mrf.mxu1 }
  0xd0   :  { %v610_v38 = vadd.f32 %v609_v50, %v284_v47 }
  0xd1   :  { %v2798_v51 = vpop.f32.mrf.mxu0  ;;  %v2170_v53 = vpop.f32.mrf.mxu1 }
  0xd2   :  { %v625_v43 = vadd.f32 %v2170_v53, %v2118_v49 }
  0xd3   :  { %v2800_v52 = vpop.f32.mrf.mxu0  ;;  %v619_v56 = vpop.f32.mrf.mxu1 }
  0xd4   :  { %v620_v45 = vadd.f32 %v619_v56, %v2798_v51 }
  0xd5   :  { %v2802_v54 = vpop.f32.mrf.mxu0  ;;  %v2173_v59 = vpop.f32.mrf.mxu1 }
  0xd6   :  { %v635_v49 = vadd.f32 %v2173_v59, %v2800_v52 }
  0xd7   :  { %v2804_v55 = vpop.f32.mrf.mxu0  ;;  %v2814_v62 = vpop.f32.mrf.mxu1 }
  0xd8   :  { %v630_v51 = vadd.f32 %v2814_v62, %v2802_v54 }
  0xd9   :  { %v2806_v57 = vpop.f32.mrf.mxu0  ;;  %v2820_v1 = vpop.f32.mrf.mxu1 }
  0xda   :  { %v645_v52 = vadd.f32 %v2820_v1, %v2804_v55 }
  0xdb   :  { %v2808_v58 = vpop.f32.mrf.mxu0  ;;  %v2826_v4 = vpop.f32.mrf.mxu1 }
  0xdc   :  { %v640_v54 = vadd.f32 %v2826_v4, %v2806_v57 }
  0xdd   :  { %v2810_v60 = vpop.f32.mrf.mxu0  ;;  %v2832_v7 = vpop.f32.mrf.mxu1 }
  0xde   :  { %v655_v55 = vadd.f32 %v2832_v7, %v2808_v58 }
  0xdf   :  { %v2812_v61 = vpop.f32.mrf.mxu0  ;;  %v2838_v10 = vpop.f32.mrf.mxu1 }
  0xe0   :  { %v650_v57 = vadd.f32 %v2838_v10, %v2810_v60 }
  0xe1   :  { %v2816_v63 = vpop.f32.mrf.mxu0  ;;  %v2844_v13 = vpop.f32.mrf.mxu1 }
  0xe2   :  { %v665_v58 = vadd.f32 %v2844_v13, %v2812_v61 }
  0xe3   :  { %v2818_v0 = vpop.f32.mrf.mxu0  ;;  %v2850_v16 = vpop.f32.mrf.mxu1 }
  0xe4   :  { %v660_v60 = vadd.f32 %v2850_v16, %v2816_v63 }
  0xe5   :  { %v2822_v2 = vpop.f32.mrf.mxu0  ;;  %v2856_v19 = vpop.f32.mrf.mxu1 }
  0xe6   :  { %v675_v61 = vadd.f32 %v2856_v19, %v2818_v0 }
  0xe7   :  { %v2824_v3 = vpop.f32.mrf.mxu0  ;;  %v2862_v22 = vpop.f32.mrf.mxu1 }
  0xe8   :  { %v670_v63 = vadd.f32 %v2862_v22, %v2822_v2 }
  0xe9   :  { %v2828_v5 = vpop.f32.mrf.mxu0  ;;  %v2868_v25 = vpop.f32.mrf.mxu1 }
  0xea   :  { %v685_v0 = vadd.f32 %v2868_v25, %v2824_v3 }
  0xeb   :  { %v2830_v6 = vpop.f32.mrf.mxu0  ;;  %v2877_v32 = vpop.f32.mrf.mxu1 }
  0xec   :  { %v680_v2 = vadd.f32 %v2877_v32, %v2828_v5 }
  0xed   :  { %v2834_v8 = vpop.f32.mrf.mxu0  ;;  %v2881_v41 = vpop.f32.mrf.mxu1 }
  0xee   :  { %v695_v3 = vadd.f32 %v2881_v41, %v2830_v6 }
  0xef   :  { %v2836_v9 = vpop.f32.mrf.mxu0  ;;  %v2887_v47 = vpop.f32.mrf.mxu1 }
  0xf0   :  { %v690_v5 = vadd.f32 %v2887_v47, %v2834_v8 }
  0xf1   :  { %v2840_v11 = vpop.f32.mrf.mxu0 }
  0xf3   :  { %v2842_v12 = vpop.f32.mrf.mxu0 }
  0xf5   :  { %v2846_v14 = vpop.f32.mrf.mxu0 }
  0xf7   :  { %v2848_v15 = vpop.f32.mrf.mxu0 }
  0xf9   :  { %v2852_v17 = vpop.f32.mrf.mxu0 }
  0xfb   :  { %v2854_v18 = vpop.f32.mrf.mxu0 }
  0xfd   :  { %v2858_v20 = vpop.f32.mrf.mxu0 }
  0xff   :  { %v2860_v21 = vpop.f32.mrf.mxu0 }
 0x101   :  { %v2864_v23 = vpop.f32.mrf.mxu0 }
 0x103   :  { %v2866_v24 = vpop.f32.mrf.mxu0 }
 0x105   :  { %v2870_v26 = vpop.f32.mrf.mxu0 }
 0x106   :  { %3120 = vst [vmem:[#allocation4_spill] sm:$0xff] %v2870_v26 }
 0x107   :  { %v2216_v28 = vpop.f32.mrf.mxu0 }
 0x108   :  { %v1117_v30 = vadd.f32 %v2216_v28, %v605_v27 }
 0x109   :  { %v957_v33 = vpop.f32.mrf.mxu0 }
 0x10a   :  { %v1116_v35 = vadd.f32 %v957_v33, %v600_v29  ;;  %v1156_v36 = vadd.f32 %v2875_v31, %v1117_v30 }
 0x10b   :  { %v2219_v37 = vpop.f32.mrf.mxu0 }
 0x10c   :  { %v1155_v39 = vadd.f32 %v2875_v31, %v1116_v35  ;;  %v1119_v40 = vadd.f32 %v2219_v37, %v615_v34  ;;  %v1188_v27 = vmax.f32 %v1156_v36, 0.0  ;;  %v2896_v36 = vpop.f32.mrf.mxu1 }
 0x10d   :  { %v967_v42 = vpop.f32.mrf.mxu0  ;;  %v705_v6 = vadd.f32 %v2896_v36, %v2836_v9 }
 0x10e   :  { %v1187_v44 = vmax.f32 %v1155_v39, 0.0  ;;  %v1118_v46 = vadd.f32 %v967_v42, %v610_v38  ;;  %v1158_v28 = vadd.f32 %v2875_v31, %v1119_v40 }
 0x10f   :  { %v2222_v26 = vpop.f32.mrf.mxu0 }
 0x110   :  { %v1157_v48 = vadd.f32 %v2875_v31, %v1118_v46  ;;  %v1121_v29 = vadd.f32 %v2222_v26, %v625_v43  ;;  %2270 = vmatprep.mubr.msk.f32.mxu1 %vm1230_vm3, %v1187_v44  ;;  %v1190_v33 = vmax.f32 %v1158_v28, 0.0  ;;  %v2906_v44 = vpop.f32.mrf.mxu1 }
 0x111   :  { %v977_v50 = vpop.f32.mrf.mxu0  ;;  %2271 = vmatmul.mubr.msk.f32.vlgmr.msra.gmra.mxu1 %vm1230_vm3, %v1188_v27  ;;  %v700_v8 = vadd.f32 %v2906_v44, %v2840_v11 }
 0x112   :  { %v1189_v53 = vmax.f32 %v1157_v48, 0.0  ;;  %v1120_v30 = vadd.f32 %v977_v50, %v620_v45  ;;  %v1160_v34 = vadd.f32 %v2875_v31, %v1121_v29  ;;  %v2916_v50 = vpop.f32.mrf.mxu1 }
 0x113   :  { %v2225_v35 = vpop.f32.mrf.mxu0  ;;  %v715_v9 = vadd.f32 %v2916_v50, %v2842_v12 }
 0x114   :  { %v1159_v56 = vadd.f32 %v2875_v31, %v1120_v30  ;;  %v1123_v26 = vadd.f32 %v2225_v35, %v635_v49  ;;  %2273 = vmatprep.mubr.msk.f32.mxu1 %vm1230_vm3, %v1189_v53  ;;  %v1192_v39 = vmax.f32 %v1160_v34, 0.0 }
 0x115   :  { %v987_v37 = vpop.f32.mrf.mxu0  ;;  %2274 = vmatmul.mubr.msk.f32.gmra.mxu1 %vm1230_vm3, %v1190_v33 }
 0x116   :  { %v1191_v59 = vmax.f32 %v1159_v56, 0.0  ;;  %v1122_v38 = vadd.f32 %v987_v37, %v630_v51  ;;  %v1162_v40 = vadd.f32 %v2875_v31, %v1123_v26  ;;  %v709_v51 = vpop.f32.mrf.mxu1 }
 0x117   :  { %v2228_v42 = vpop.f32.mrf.mxu0  ;;  %v710_v11 = vadd.f32 %v709_v51, %v2846_v14 }
 0x118   :  { %v1161_v62 = vadd.f32 %v2875_v31, %v1122_v38  ;;  %v1125_v43 = vadd.f32 %v2228_v42, %v645_v52  ;;  %2276 = vmatprep.mubr.msk.f32.mxu1 %vm1230_vm3, %v1191_v59  ;;  %v1194_v28 = vmax.f32 %v1162_v40, 0.0 }
 0x119   :  { %v997_v46 = vpop.f32.mrf.mxu0  ;;  %2277 = vmatmul.mubr.msk.f32.gmra.mxu1 %vm1230_vm3, %v1192_v39  ;;  %v2200_v39 = vpop.f32.mrf.mxu1 }
 0x11a   :  { %v1193_v1 = vmax.f32 %v1161_v62, 0.0  ;;  %v1124_v27 = vadd.f32 %v997_v46, %v640_v54  ;;  %v1164_v45 = vadd.f32 %v2875_v31, %v1125_v43 }
 0x11b   :  { %v2231_v48 = vpop.f32.mrf.mxu0 }
 0x11c   :  { %v1163_v4 = vadd.f32 %v2875_v31, %v1124_v27  ;;  %v1127_v29 = vadd.f32 %v2231_v48, %v655_v55  ;;  %2279 = vmatprep.mubr.msk.f32.mxu1 %vm1230_vm3, %v1193_v1  ;;  %v1196_v30 = vmax.f32 %v1164_v45, 0.0  ;;  %v719_v55 = vpop.f32.mrf.mxu1 }
 0x11d   :  { %v1007_v49 = vpop.f32.mrf.mxu0  ;;  %2280 = vmatmul.mubr.msk.f32.gmra.mxu1 %vm1230_vm3, %v1194_v28 }
 0x11e   :  { %v1195_v7 = vmax.f32 %v1163_v4, 0.0  ;;  %v1126_v53 = vadd.f32 %v1007_v49, %v650_v57  ;;  %v1166_v33 = vadd.f32 %v2875_v31, %v1127_v29  ;;  %v2203_v4 = vpop.f32.mrf.mxu1 }
 0x11f   :  { %v2234_v34 = vpop.f32.mrf.mxu0 }
 0x120   :  { %v1165_v10 = vadd.f32 %v2875_v31, %v1126_v53  ;;  %v1129_v35 = vadd.f32 %v2234_v34, %v665_v58  ;;  %2282 = vmatprep.mubr.msk.f32.mxu1 %vm1230_vm3, %v1195_v7  ;;  %v1198_v37 = vmax.f32 %v1166_v33, 0.0  ;;  %v729_v33 = vpop.f32.mrf.mxu1 }
 0x121   :  { %v1017_v56 = vpop.f32.mrf.mxu0  ;;  %2283 = vmatmul.mubr.msk.f32.gmra.mxu1 %vm1230_vm3, %v1196_v30 }
 0x122   :  { %v1197_v13 = vmax.f32 %v1165_v10, 0.0  ;;  %v1128_v26 = vadd.f32 %v1017_v56, %v660_v60  ;;  %v1168_v52 = vadd.f32 %v2875_v31, %v1129_v35 }
 0x123   :  { %v2237_v59 = vpop.f32.mrf.mxu0 }
 0x124   :  { %v1167_v16 = vadd.f32 %v2875_v31, %v1128_v26  ;;  %v1131_v38 = vadd.f32 %v2237_v59, %v675_v61  ;;  %2285 = vmatprep.mubr.msk.f32.mxu1 %vm1230_vm3, %v1197_v13  ;;  %v1200_v54 = vmax.f32 %v1168_v52, 0.0  ;;  %v2206_v13 = vpop.f32.mrf.mxu1 }
 0x125   :  { %v1027_v40 = vpop.f32.mrf.mxu0  ;;  %2286 = vmatmul.mubr.msk.f32.gmra.mxu1 %vm1230_vm3, %v1198_v37  ;;  %v725_v37 = vadd.f32 %v2200_v39, %v2848_v15 }
 0x126   :  { %v1199_v19 = vmax.f32 %v1167_v16, 0.0  ;;  %v1130_v42 = vadd.f32 %v1027_v40, %v670_v63  ;;  %v1170_v62 = vadd.f32 %v2875_v31, %v1131_v38  ;;  %v720_v16 = vadd.f32 %v719_v55, %v2852_v17  ;;  %v739_v38 = vpop.f32.mrf.mxu1 }
 0x127   :  { %v2240_v43 = vpop.f32.mrf.mxu0 }
 0x128   :  { %v1169_v22 = vadd.f32 %v2875_v31, %v1130_v42  ;;  %v1133_v46 = vadd.f32 %v2240_v43, %v685_v0  ;;  %2288 = vmatprep.mubr.msk.f32.mxu1 %vm1230_vm3, %v1199_v19  ;;  %v1202_v28 = vmax.f32 %v1170_v62, 0.0  ;;  %v735_v0 = vadd.f32 %v2203_v4, %v2854_v18 }
 0x129   :  { %v1037_v1 = vpop.f32.mrf.mxu0  ;;  %2289 = vmatmul.mubr.msk.f32.gmra.mxu1 %vm1230_vm3, %v1200_v54  ;;  %v730_v62 = vadd.f32 %v729_v33, %v2858_v20 }
 0x12a   :  { %v1201_v25 = vmax.f32 %v1169_v22, 0.0  ;;  %v1132_v27 = vadd.f32 %v1037_v1, %v680_v2  ;;  %v1172_v45 = vadd.f32 %v2875_v31, %v1133_v46  ;;  %v2209_v2 = vpop.f32.mrf.mxu1  ;;  %v745_v46 = vadd.f32 %v2206_v13, %v2860_v21 }
 0x12b   :  { %v2243_v48 = vpop.f32.mrf.mxu0 }
 0x12c   :  { %v1171_v32 = vadd.f32 %v2875_v31, %v1132_v27  ;;  %v1135_v57 = vadd.f32 %v2243_v48, %v695_v3  ;;  %2291 = vmatprep.mubr.msk.f32.mxu1 %vm1230_vm3, %v1201_v25  ;;  %v1204_v58 = vmax.f32 %v1172_v45, 0.0  ;;  %v740_v27 = vadd.f32 %v739_v38, %v2864_v23  ;;  %v749_v45 = vpop.f32.mrf.mxu1 }
 0x12d   :  { %v1047_v29 = vpop.f32.mrf.mxu0  ;;  %2292 = vmatmul.mubr.msk.f32.gmra.mxu1 %vm1230_vm3, %v1202_v28 }
 0x12e   :  { %v1203_v41 = vmax.f32 %v1171_v32, 0.0  ;;  %v1134_v49 = vadd.f32 %v1047_v29, %v690_v5  ;;  %v1174_v7 = vadd.f32 %v2875_v31, %v1135_v57  ;;  %v755_v5 = vadd.f32 %v2209_v2, %v2866_v24 }
 0x12f   :  { %v2246_v53 = vpop.f32.mrf.mxu0 }
 0x130   :  { %v1173_v47 = vadd.f32 %v2875_v31, %v1134_v49  ;;  %v1137_v30 = vadd.f32 %v2246_v53, %v705_v6  ;;  %2294 = vmatprep.mubr.msk.f32.mxu1 %vm1230_vm3, %v1203_v41  ;;  %v1206_v10 = vmax.f32 %v1174_v7, 0.0  ;;  %v3121_v6 = vld [vmem:[#allocation4_spill] sm:$0xff] }
 0x131   :  { %v1057_v34 = vpop.f32.mrf.mxu0  ;;  %2295 = vmatmul.mubr.msk.f32.gmra.mxu1 %vm1230_vm3, %v1204_v58  ;;  %v750_v41 = vadd.f32 %v749_v45, %v3121_v6 }
 0x132   :  { %v1205_v36 = vmax.f32 %v1173_v47, 0.0  ;;  %v1136_v60 = vadd.f32 %v1057_v34, %v700_v8  ;;  %v1176_v35 = vadd.f32 %v2875_v31, %v1137_v30  ;;  %v2999_v34 = vld [vmem:[%s3116_s8] ss:$0 sm:$0xff] }
 0x133   :  { %v2249_v56 = vpop.f32.mrf.mxu0 }
 0x134   :  { %v1175_v44 = vadd.f32 %v2875_v31, %v1136_v60  ;;  %v1139_v61 = vadd.f32 %v2249_v56, %v715_v9  ;;  %2297 = vmatprep.mubr.msk.f32.mxu1 %vm1230_vm3, %v1205_v36  ;;  %v1208_v52 = vmax.f32 %v1176_v35, 0.0 }
 0x135   :  { %v1067_v26 = vpop.f32.mrf.mxu0  ;;  %2298 = vmatmul.mubr.msk.f32.gmra.mxu1 %vm1230_vm3, %v1206_v10 }
 0x136   :  { %v1207_v12 = vmax.f32 %v1175_v44, 0.0  ;;  %v1138_v50 = vadd.f32 %v1067_v26, %v710_v11  ;;  %v1178_v59 = vadd.f32 %v2875_v31, %v1139_v61 }
 0x137   :  { %v2252_v63 = vpop.f32.mrf.mxu0 }
 0x138   :  { %v1177_v14 = vadd.f32 %v2875_v31, %v1138_v50  ;;  %v1141_v51 = vadd.f32 %v2252_v63, %v725_v37  ;;  %2300 = vmatprep.mubr.msk.f32.mxu1 %vm1230_vm3, %v1207_v12  ;;  %v1210_v19 = vmax.f32 %v1178_v59, 0.0 }
 0x139   :  { %v1077_v40 = vpop.f32.mrf.mxu0  ;;  %2301 = vmatmul.mubr.msk.f32.gmra.mxu1 %vm1230_vm3, %v1208_v52 }
 0x13a   :  { %v1209_v15 = vmax.f32 %v1177_v14, 0.0  ;;  %v1140_v39 = vadd.f32 %v1077_v40, %v720_v16  ;;  %v1180_v42 = vadd.f32 %v2875_v31, %v1141_v51 }
 0x13b   :  { %v2255_v54 = vpop.f32.mrf.mxu0 }
 0x13c   :  { %v1179_v17 = vadd.f32 %v2875_v31, %v1140_v39  ;;  %v1143_v43 = vadd.f32 %v2255_v54, %v735_v0  ;;  %2303 = vmatprep.mubr.msk.f32.mxu1 %vm1230_vm3, %v1209_v15  ;;  %v1212_v1 = vmax.f32 %v1180_v42, 0.0 }
 0x13d   :  { %v1087_v22 = vpop.f32.mrf.mxu0  ;;  %2304 = vmatmul.mubr.msk.f32.gmra.mxu1 %vm1230_vm3, %v1210_v19 }
 0x13e   :  { %v1211_v18 = vmax.f32 %v1179_v17, 0.0  ;;  %v1142_v55 = vadd.f32 %v1087_v22, %v730_v62  ;;  %v1182_v3 = vadd.f32 %v2875_v31, %v1143_v43 }
 0x13f   :  { %v2258_v25 = vpop.f32.mrf.mxu0 }
 0x140   :  { %v1181_v20 = vadd.f32 %v2875_v31, %v1142_v55  ;;  %v1145_v28 = vadd.f32 %v2258_v25, %v745_v46  ;;  %2306 = vmatprep.mubr.msk.f32.mxu1 %vm1230_vm3, %v1211_v18  ;;  %v1214_v57 = vmax.f32 %v1182_v3, 0.0 }
 0x141   :  { %v1097_v48 = vpop.f32.mrf.mxu0  ;;  %2307 = vmatmul.mubr.msk.f32.gmra.mxu1 %vm1230_vm3, %v1212_v1 }
 0x142   :  { %v1213_v21 = vmax.f32 %v1181_v20, 0.0  ;;  %v1144_v32 = vadd.f32 %v1097_v48, %v740_v27  ;;  %v1184_v4 = vadd.f32 %v2875_v31, %v1145_v28 }
 0x143   :  { %v2261_v29 = vpop.f32.mrf.mxu0 }
 0x144   :  { %v1183_v23 = vadd.f32 %v2875_v31, %v1144_v32  ;;  %v1147_v49 = vadd.f32 %v2261_v29, %v755_v5  ;;  %2309 = vmatprep.mubr.msk.f32.mxu1 %vm1230_vm3, %v1213_v21  ;;  %v1216_v8 = vmax.f32 %v1184_v4, 0.0 }
 0x145   :  { %v1107_v58 = vpop.f32.mrf.mxu0  ;;  %2310 = vmatmul.mubr.msk.f32.gmra.mxu1 %vm1230_vm3, %v1214_v57 }
 0x146   :  { %v1215_v7 = vmax.f32 %v1183_v23, 0.0  ;;  %v1146_v53 = vadd.f32 %v1107_v58, %v750_v41  ;;  %v1186_v24 = vadd.f32 %v2875_v31, %v1147_v49 }
 0x148   :  { %v1185_v47 = vadd.f32 %v2875_v31, %v1146_v53  ;;  %2312 = vmatprep.mubr.msk.f32.mxu1 %vm1230_vm3, %v1215_v7  ;;  %v1218_v33 = vmax.f32 %v1186_v24, 0.0  ;;  %v3005_v31 = vld [vmem:[%s3117_s9] ss:$0 sm:$0xff] }
 0x149   :  { %2313 = vmatmul.mubr.msk.f32.gmra.mxu1 %vm1230_vm3, %v1216_v8 }
 0x14a   :  { %v1217_v30 = vmax.f32 %v1185_v47, 0.0 }
 0x14c   :  { %2315 = vmatprep.mubr.msk.f32.mxu1 %vm1230_vm3, %v1217_v30 }
 0x14d   :  { %2316 = vmatmul.mubr.msk.f32.gmra.mxu1 %vm1230_vm3, %v1218_v33 }
 0x1d1   :  { %v2272_v9 = vpop.f32.mrf.mxu1 }
 0x1d2   :  { %v1399_v36 = vadd.f32 %v2272_v9, %v2999_v34 }
 0x1d3   :  { %v1393_v60 = vpop.f32.mrf.mxu1 }
 0x1d4   :  { %v1553_v10 = vmax.f32 %v1399_v36, 0.0  ;;  %v1394_v35 = vadd.f32 %v2999_v34, %v1393_v60 }
 0x1d5   :  { %v2275_v56 = vpop.f32.mrf.mxu1 }
 0x1d6   :  { %v1552_v11 = vmax.f32 %v1394_v35, 0.0  ;;  %v1409_v44 = vadd.f32 %v2275_v56, %v2999_v34  ;;  %v1592_v61 = vmul.f32 %v3005_v31, %v1553_v10 }
 0x1d7   :  { %v1403_v13 = vpop.f32.mrf.mxu1 }
 0x1d8   :  { %v1555_v26 = vmax.f32 %v1409_v44, 0.0  ;;  %v1404_v37 = vadd.f32 %v2999_v34, %v1403_v13  ;;  %v1626_v12 = vsel %vm1230_vm3, %v1592_v61, 0.0  ;;  %v1591_v50 = vmul.f32 %v3005_v31, %v1552_v11 }
 0x1d9   :  { %1627 = vadd.xlane.f32.xlu0 %v1626_v12  ;;  %v2278_v52 = vpop.f32.mrf.mxu1 }
 0x1da   :  { %v1554_v59 = vmax.f32 %v1404_v37, 0.0  ;;  %v1419_v63 = vadd.f32 %v2278_v52, %v2999_v34  ;;  %v1594_v16 = vmul.f32 %v3005_v31, %v1555_v26  ;;  %v1623_v51 = vsel %vm1230_vm3, %v1591_v50, 0.0 }
 0x1db   :  { %v1413_v14 = vpop.f32.mrf.mxu1 }
 0x1dc   :  { %v1557_v38 = vmax.f32 %v1419_v63, 0.0  ;;  %v1414_v40 = vadd.f32 %v2999_v34, %v1413_v14  ;;  %v1632_v0 = vsel %vm1230_vm3, %v1594_v16, 0.0  ;;  %v1593_v15 = vmul.f32 %v3005_v31, %v1554_v59 }
 0x1dd   :  { %1633 = vadd.xlane.f32.xlu1 %v1632_v0  ;;  %v2281_v39 = vpop.f32.mrf.mxu1  ;;  %1624 = vadd.xlane.f32.xlu0 %v1623_v51 }
 0x1de   :  { %v1556_v19 = vmax.f32 %v1414_v40, 0.0  ;;  %v1429_v42 = vadd.f32 %v2281_v39, %v2999_v34  ;;  %v1629_v62 = vsel %vm1230_vm3, %v1593_v15, 0.0  ;;  %v1596_v22 = vmul.f32 %v3005_v31, %v1557_v38 }
 0x1df   :  { %v1423_v54 = vpop.f32.mrf.mxu1 }
 0x1e0   :  { %v1559_v17 = vmax.f32 %v1429_v42, 0.0  ;;  %v1424_v43 = vadd.f32 %v2999_v34, %v1423_v54  ;;  %v1595_v2 = vmul.f32 %v3005_v31, %v1556_v19  ;;  %v1638_v28 = vsel %vm1230_vm3, %v1596_v22, 0.0 }
 0x1e1   :  { %v2284_v46 = vpop.f32.mrf.mxu1  ;;  %1630 = vadd.xlane.f32.xlu1 %v1629_v62 }
 0x1e2   :  { %v1558_v18 = vmax.f32 %v1424_v43, 0.0  ;;  %v1439_v55 = vadd.f32 %v2284_v46, %v2999_v34  ;;  %v1635_v1 = vsel %vm1230_vm3, %v1595_v2, 0.0  ;;  %v1598_v25 = vmul.f32 %v3005_v31, %v1559_v17 }
 0x1e3   :  { %v1433_v3 = vpop.f32.mrf.mxu1  ;;  %1636 = vadd.xlane.f32.xlu0 %v1635_v1 }
 0x1e4   :  { %v1561_v27 = vmax.f32 %v1439_v55, 0.0  ;;  %v1434_v20 = vadd.f32 %v2999_v34, %v1433_v3  ;;  %v1597_v45 = vmul.f32 %v3005_v31, %v1558_v18  ;;  %v1644_v4 = vsel %vm1230_vm3, %v1598_v25, 0.0 }
 0x1e5   :  { %v2287_v48 = vpop.f32.mrf.mxu1  ;;  %1639 = vadd.xlane.f32.xlu1 %v1638_v28 }
 0x1e6   :  { %v1560_v5 = vmax.f32 %v1434_v20, 0.0  ;;  %v1449_v21 = vadd.f32 %v2287_v48, %v2999_v34  ;;  %v1641_v32 = vsel %vm1230_vm3, %v1597_v45, 0.0  ;;  %v1600_v23 = vmul.f32 %v3005_v31, %v1561_v27 }
 0x1e7   :  { %v1443_v57 = vpop.f32.mrf.mxu1  ;;  %1642 = vadd.xlane.f32.xlu0 %v1641_v32 }
 0x1e8   :  { %v1563_v29 = vmax.f32 %v1449_v21, 0.0  ;;  %v1444_v6 = vadd.f32 %v2999_v34, %v1443_v57  ;;  %v1599_v41 = vmul.f32 %v3005_v31, %v1560_v5  ;;  %v1650_v33 = vsel %vm1230_vm3, %v1600_v23, 0.0 }
 0x1e9   :  { %v2290_v49 = vpop.f32.mrf.mxu1  ;;  %1645 = vadd.xlane.f32.xlu1 %v1644_v4 }
 0x1ea   :  { %v1562_v58 = vmax.f32 %v1444_v6, 0.0  ;;  %v1459_v7 = vadd.f32 %v2290_v49, %v2999_v34  ;;  %v1647_v53 = vsel %vm1230_vm3, %v1599_v41, 0.0  ;;  %v1602_v24 = vmul.f32 %v3005_v31, %v1563_v29 }
 0x1eb   :  { %v1453_v8 = vpop.f32.mrf.mxu1  ;;  %1648 = vadd.xlane.f32.xlu0 %v1647_v53 }
 0x1ec   :  { %v1565_v47 = vmax.f32 %v1459_v7, 0.0  ;;  %v1454_v30 = vadd.f32 %v2999_v34, %v1453_v8  ;;  %v1601_v9 = vmul.f32 %v3005_v31, %v1562_v58  ;;  %v1656_v11 = vsel %vm1230_vm3, %v1602_v24, 0.0 }
 0x1ed   :  { %v2293_v36 = vpop.f32.mrf.mxu1  ;;  %1651 = vadd.xlane.f32.xlu1 %v1650_v33 }
 0x1ee   :  { %v1564_v60 = vmax.f32 %v1454_v30, 0.0  ;;  %v1469_v10 = vadd.f32 %v2293_v36, %v2999_v34  ;;  %v1653_v35 = vsel %vm1230_vm3, %v1601_v9, 0.0  ;;  %v1604_v26 = vmul.f32 %v3005_v31, %v1565_v47 }
 0x1ef   :  { %v1463_v56 = vpop.f32.mrf.mxu1  ;;  %1654 = vadd.xlane.f32.xlu0 %v1653_v35 }
 0x1f0   :  { %v1567_v44 = vmax.f32 %v1469_v10, 0.0  ;;  %v1464_v61 = vadd.f32 %v2999_v34, %v1463_v56  ;;  %v1603_v13 = vmul.f32 %v3005_v31, %v1564_v60  ;;  %v1662_v51 = vsel %vm1230_vm3, %v1604_v26, 0.0 }
 0x1f1   :  { %v2296_v37 = vpop.f32.mrf.mxu1  ;;  %1657 = vadd.xlane.f32.xlu1 %v1656_v11 }
 0x1f2   :  { %v1566_v12 = vmax.f32 %v1464_v61, 0.0  ;;  %v1479_v50 = vadd.f32 %v2296_v37, %v2999_v34  ;;  %v1659_v52 = vsel %vm1230_vm3, %v1603_v13, 0.0  ;;  %v1606_v63 = vmul.f32 %v3005_v31, %v1567_v44 }
 0x1f3   :  { %v1473_v59 = vpop.f32.mrf.mxu1  ;;  %1660 = vadd.xlane.f32.xlu0 %v1659_v52 }
 0x1f4   :  { %v1569_v16 = vmax.f32 %v1479_v50, 0.0  ;;  %v1474_v14 = vadd.f32 %v2999_v34, %v1473_v59  ;;  %v1605_v38 = vmul.f32 %v3005_v31, %v1566_v12  ;;  %v1668_v42 = vsel %vm1230_vm3, %v1606_v63, 0.0 }
 0x1f5   :  { %v2299_v40 = vpop.f32.mrf.mxu1  ;;  %1663 = vadd.xlane.f32.xlu1 %v1662_v51 }
 0x1f6   :  { %v1568_v0 = vmax.f32 %v1474_v14, 0.0  ;;  %v1489_v15 = vadd.f32 %v2299_v40, %v2999_v34  ;;  %v1665_v39 = vsel %vm1230_vm3, %v1605_v38, 0.0  ;;  %v1608_v43 = vmul.f32 %v3005_v31, %v1569_v16 }
 0x1f7   :  { %v1483_v19 = vpop.f32.mrf.mxu1  ;;  %1666 = vadd.xlane.f32.xlu0 %v1665_v39 }
 0x1f8   :  { %v1571_v54 = vmax.f32 %v1489_v15, 0.0  ;;  %v1484_v62 = vadd.f32 %v2999_v34, %v1483_v19  ;;  %v1607_v17 = vmul.f32 %v3005_v31, %v1568_v0  ;;  %v1674_v27 = vsel %vm1230_vm3, %v1608_v43, 0.0 }
 0x1f9   :  { %v2302_v2 = vpop.f32.mrf.mxu1  ;;  %1669 = vadd.xlane.f32.xlu1 %v1668_v42 }
 0x1fa   :  { %v1570_v22 = vmax.f32 %v1484_v62, 0.0  ;;  %v1499_v46 = vadd.f32 %v2302_v2, %v2999_v34  ;;  %v1671_v18 = vsel %vm1230_vm3, %v1607_v17, 0.0  ;;  %v1610_v1 = vmul.f32 %v3005_v31, %v1571_v54 }
 0x1fb   :  { %v1493_v55 = vpop.f32.mrf.mxu1  ;;  %1672 = vadd.xlane.f32.xlu0 %v1671_v18 }
 0x1fc   :  { %v1573_v3 = vmax.f32 %v1499_v46, 0.0  ;;  %v1494_v25 = vadd.f32 %v2999_v34, %v1493_v55  ;;  %v1609_v20 = vmul.f32 %v3005_v31, %v1570_v22  ;;  %v1680_v32 = vsel %vm1230_vm3, %v1610_v1, 0.0  ;;  %v1970_v55 = vld [vmem:[#allocation2] ss:$0 sm:$0xff] }
 0x1fd   :  { %v2305_v28 = vpop.f32.mrf.mxu1  ;;  %1675 = vadd.xlane.f32.xlu1 %v1674_v27 }
 0x1fe   :  { %v1572_v45 = vmax.f32 %v1494_v25, 0.0  ;;  %v1509_v48 = vadd.f32 %v2305_v28, %v2999_v34  ;;  %v1677_v5 = vsel %vm1230_vm3, %v1609_v20, 0.0  ;;  %v1612_v6 = vmul.f32 %v3005_v31, %v1573_v3 }
 0x1ff   :  { %v1503_v21 = vpop.f32.mrf.mxu1  ;;  %1678 = vadd.xlane.f32.xlu0 %v1677_v5 }
 0x200   :  { %v1575_v57 = vmax.f32 %v1509_v48, 0.0  ;;  %v1504_v4 = vadd.f32 %v2999_v34, %v1503_v21  ;;  %v1611_v29 = vmul.f32 %v3005_v31, %v1572_v45  ;;  %v1686_v47 = vsel %vm1230_vm3, %v1612_v6, 0.0 }
 0x201   :  { %v2308_v41 = vpop.f32.mrf.mxu1  ;;  %1681 = vadd.xlane.f32.xlu1 %v1680_v32 }
 0x202   :  { %v1574_v23 = vmax.f32 %v1504_v4, 0.0  ;;  %v1519_v49 = vadd.f32 %v2308_v41, %v2999_v34  ;;  %v1683_v58 = vsel %vm1230_vm3, %v1611_v29, 0.0  ;;  %v1614_v53 = vmul.f32 %v3005_v31, %v1575_v57 }
 0x203   :  { %v1513_v7 = vpop.f32.mrf.mxu1  ;;  %1684 = vadd.xlane.f32.xlu0 %v1683_v58 }
 0x204   :  { %v1577_v8 = vmax.f32 %v1519_v49, 0.0  ;;  %v1514_v24 = vadd.f32 %v2999_v34, %v1513_v7  ;;  %v1613_v30 = vmul.f32 %v3005_v31, %v1574_v23  ;;  %v1692_v35 = vsel %vm1230_vm3, %v1614_v53, 0.0 }
 0x205   :  { %v2311_v33 = vpop.f32.mrf.mxu1  ;;  %1687 = vadd.xlane.f32.xlu1 %v1686_v47 }
 0x206   :  { %v1576_v9 = vmax.f32 %v1514_v24, 0.0  ;;  %v1529_v36 = vadd.f32 %v2311_v33, %v2999_v34  ;;  %v1689_v60 = vsel %vm1230_vm3, %v1613_v30, 0.0  ;;  %v1616_v61 = vmul.f32 %v3005_v31, %v1577_v8 }
 0x207   :  { %v1523_v10 = vpop.f32.mrf.mxu1  ;;  %1690 = vadd.xlane.f32.xlu0 %v1689_v60 }
 0x208   :  { %v1579_v56 = vmax.f32 %v1529_v36, 0.0  ;;  %v1524_v11 = vadd.f32 %v2999_v34, %v1523_v10  ;;  %v1615_v44 = vmul.f32 %v3005_v31, %v1576_v9  ;;  %v1698_v16 = vsel %vm1230_vm3, %v1616_v61, 0.0 }
 0x209   :  { %v2314_v13 = vpop.f32.mrf.mxu1  ;;  %1693 = vadd.xlane.f32.xlu1 %v1692_v35 }
 0x20a   :  { %v1578_v26 = vmax.f32 %v1524_v11, 0.0  ;;  %v1539_v37 = vadd.f32 %v2314_v13, %v2999_v34  ;;  %v1695_v12 = vsel %vm1230_vm3, %v1615_v44, 0.0  ;;  %v1618_v52 = vmul.f32 %v3005_v31, %v1579_v56 }
 0x20b   :  { %v1533_v50 = vpop.f32.mrf.mxu1  ;;  %1696 = vadd.xlane.f32.xlu0 %v1695_v12 }
 0x20c   :  { %v1581_v59 = vmax.f32 %v1539_v37, 0.0  ;;  %v1534_v63 = vadd.f32 %v2999_v34, %v1533_v50  ;;  %v1617_v14 = vmul.f32 %v3005_v31, %v1578_v26  ;;  %v1704_v39 = vsel %vm1230_vm3, %v1618_v52, 0.0 }
 0x20d   :  { %v2317_v51 = vpop.f32.mrf.mxu1  ;;  %1699 = vadd.xlane.f32.xlu1 %v1698_v16 }
 0x20e   :  { %v1580_v38 = vmax.f32 %v1534_v63, 0.0  ;;  %v1549_v40 = vadd.f32 %v2317_v51, %v2999_v34  ;;  %v1701_v0 = vsel %vm1230_vm3, %v1617_v14, 0.0  ;;  %v1620_v62 = vmul.f32 %v3005_v31, %v1581_v59 }
 0x20f   :  { %v1543_v15 = vpop.f32.mrf.mxu1  ;;  %1702 = vadd.xlane.f32.xlu0 %v1701_v0 }
 0x210   :  { %v1583_v19 = vmax.f32 %v1549_v40, 0.0  ;;  %v1544_v42 = vadd.f32 %v2999_v34, %v1543_v15  ;;  %v1619_v54 = vmul.f32 %v3005_v31, %v1580_v38  ;;  %v1710_v22 = vsel %vm1230_vm3, %v1620_v62, 0.0 }
 0x211   :  { %1705 = vadd.xlane.f32.xlu1 %v1704_v39 }
 0x212   :  { %v1582_v17 = vmax.f32 %v1544_v42, 0.0  ;;  %v1707_v43 = vsel %vm1230_vm3, %v1619_v54, 0.0  ;;  %v1622_v2 = vmul.f32 %v3005_v31, %v1583_v19 }
 0x213   :  { %1708 = vadd.xlane.f32.xlu0 %v1707_v43 }
 0x214   :  { %v1621_v46 = vmul.f32 %v3005_v31, %v1582_v17  ;;  %v1716_v34 = vsel %vm1230_vm3, %v1622_v2, 0.0 }
 0x215   :  { %1711 = vadd.xlane.f32.xlu1 %v1710_v22 }
 0x216   :  { %v1713_v18 = vsel %vm1230_vm3, %v1621_v46, 0.0 }
 0x217   :  { %1714 = vadd.xlane.f32.xlu0 %v1713_v18 }
 0x219   :  { %1717 = vadd.xlane.f32.xlu1 %v1716_v34 }
 0x262   :  { %v1628_v1 = vpop.xlane.xlu0 %1627 }
 0x263   :  { %v1727_v3 = vadd.f32 %v1970_v55, %v1628_v1 }
 0x265   :  { %1760 = vst.msk [vmem:[#allocation3 + $0x8] sm:$0xff] %vm1758_vm4, %v1727_v3 }
 0x266   :  { %v1634_v25 = vpop.xlane.xlu1 %1633  ;;  %v1625_v27 = vpop.xlane.xlu0 %1624 }
 0x267   :  { %v1726_v20 = vadd.f32 %v1970_v55, %v1625_v27 }
 0x269   :  { %1759 = vst.msk [vmem:[#allocation3] sm:$0xff] %vm1758_vm4, %v1726_v20 }
 0x26a   :  { %v1631_v28 = vpop.xlane.xlu1 %1630 }
 0x26c   :  { %v1825_v45 = vld [vmem:[#allocation3 + $0x8] sm:$0xff]  ;;  %v1637_v48 = vpop.xlane.xlu0 %1636 }
 0x26d   :  { %1826 = vst [vmem:[%s3119_s11 + $0x8] sm:$0xff] %v1825_v45 }
 0x26e   :  { %v1640_v31 = vpop.xlane.xlu1 %1639 }
 0x270   :  { %v1823_v5 = vld [vmem:[#allocation3] sm:$0xff]  ;;  %v1643_v21 = vpop.xlane.xlu0 %1642 }
 0x271   :  { %1824 = vst [vmem:[%s3119_s11] sm:$0xff] %v1823_v5 }
 0x272   :  { %v1646_v32 = vpop.xlane.xlu1 %1645 }
 0x274   :  { %v1649_v57 = vpop.xlane.xlu0 %1648 }
 0x276   :  { %v1652_v4 = vpop.xlane.xlu1 %1651 }
 0x278   :  { %v1655_v29 = vpop.xlane.xlu0 %1654 }
 0x27a   :  { %v1658_v6 = vpop.xlane.xlu1 %1657 }
 0x27c   :  { %v1661_v41 = vpop.xlane.xlu0 %1660 }
 0x27e   :  { %v1664_v23 = vpop.xlane.xlu1 %1663 }
 0x280   :  { %v1667_v49 = vpop.xlane.xlu0 %1666 }
 0x282   :  { %v1670_v58 = vpop.xlane.xlu1 %1669 }
 0x284   :  { %v1673_v7 = vpop.xlane.xlu0 %1672 }
 0x286   :  { %v1676_v53 = vpop.xlane.xlu1 %1675 }
 0x288   :  { %v1679_v8 = vpop.xlane.xlu0 %1678 }
 0x28a   :  { %v1682_v24 = vpop.xlane.xlu1 %1681 }
 0x28c   :  { %v1685_v47 = vpop.xlane.xlu0 %1684 }
 0x28e   :  { %v1688_v30 = vpop.xlane.xlu1 %1687 }
 0x290   :  { %v1691_v33 = vpop.xlane.xlu0 %1690 }
 0x292   :  { %v1694_v9 = vpop.xlane.xlu1 %1693 }
 0x294   :  { %v1697_v36 = vpop.xlane.xlu0 %1696 }
 0x296   :  { %v1700_v60 = vpop.xlane.xlu1 %1699 }
 0x298   :  { %v1703_v10 = vpop.xlane.xlu0 %1702 }
 0x29a   :  { %v1706_v35 = vpop.xlane.xlu1 %1705 }
 0x29c   :  { %v1709_v56 = vpop.xlane.xlu0 %1708 }
 0x29e   :  { %v1712_v11 = vpop.xlane.xlu1 %1711 }
 0x2a0   :  { %v1715_v44 = vpop.xlane.xlu0 %1714 }
 0x2a2   :  { %v1718_v61 = vpop.xlane.xlu1 %1717 }

</bundles_post_ra>
